<compile_context>
chip_gen: v7x
topology: tpu7x:2x2x1
jax: 0.10.0
libtpu: 0.0.40
codegen_flags: <defaults>
</compile_context>

<pallas_src>
import jax
import jax.numpy as jnp
from jax import lax
from jax.experimental import pallas as pl
from jax.experimental.pallas import tpu as pltpu


def _round_up(x, m):
    return (x + m - 1) // m * m


def _cdiv(a, b):
    return -(-a // b)


_PANEL_LANES = 2048                       # 16 vregs per accumulation panel
_INPUT_VMEM_BUDGET = 16 * 1024 * 1024     # double-buffered input stream budget


def _accum_tile(pred_ref, tgt_ref, num_ref, den_ref, *, tb, tn, valid_cols,
                panel_lanes):
    """Add per-row sums of pred*targets and pred+targets over the first
    `valid_cols` columns of the current (tb, tn) tile into (tb, 1) partials.

    Static Python loop over lane panels; the lone partially-valid panel of a
    tail tile is masked against the true N (static pattern).  Panels fully
    beyond `valid_cols` are never loaded.
    """
    for start in range(0, tn, panel_lanes):
        if start >= valid_cols:
            break                                   # rest of the tile is padding
        width = min(panel_lanes, tn - start)        # static, multiple of 128
        cols = slice(start, start + width)
        p = pred_ref[:, cols].astype(jnp.float32)
        t = tgt_ref[:, cols].astype(jnp.float32)
        prod, tot = p * t, p + t
        rem = valid_cols - start
        if rem < width:
            # Tail panel: zero lanes beyond the true N before reducing.
            keep = lax.broadcasted_iota(jnp.int32, (tb, width), 1) < rem
            prod = jnp.where(keep, prod, 0.0)
            tot = jnp.where(keep, tot, 0.0)
        num_ref[...] += jnp.sum(prod, axis=1, keepdims=True)
        den_ref[...] += jnp.sum(tot, axis=1, keepdims=True)


def _make_kernel(*, tb, tn, n_tiles, n_shards, tiles_per_shard, tail_cols,
                 panel_lanes):
    full_tiles = n_tiles - 1 if tail_cols else n_tiles
    every_step_full = (full_tiles == n_shards * tiles_per_shard)

    def kernel(pred_ref, tgt_ref, num_ref, den_ref):
        s = pl.program_id(0)              # reduction shard        ("parallel")
        j = pl.program_id(2)              # N-tile within shard    ("arbitrary")
        g = s * tiles_per_shard + j       # global N-tile index

        @pl.when(j == 0)
        def _init():
            num_ref[...] = jnp.zeros_like(num_ref)
            den_ref[...] = jnp.zeros_like(den_ref)

        def accum(valid_cols):
            _accum_tile(pred_ref, tgt_ref, num_ref, den_ref, tb=tb, tn=tn,
                        valid_cols=valid_cols, panel_lanes=panel_lanes)

        if full_tiles > 0:
            if every_step_full:
                accum(tn)
            else:
                @pl.when(g < full_tiles)
                def _full_tile():
                    accum(tn)

        if tail_cols:
            @pl.when(g == n_tiles - 1)
            def _tail_tile():
                accum(tail_cols)

        # Grid steps with g >= n_tiles (at most the one padding step of the
        # last shard when the tile count is odd) accumulate nothing.

    return kernel


def dice_loss(pred, targets, *, block_cols=None):
    """DiceLoss.forward: mean over rows of 1 - (2*sum(p*t)+1) / (sum(p+t)+1).

    `pred`/`targets` may be any float or integer dtype (pass bf16 preds and
    int8/bool targets to cut HBM bytes); accumulation is f32 in-kernel.
    `block_cols` is a test-only override of the N-tile width.
    """
    assert pred.shape == targets.shape and pred.ndim == 2
    B, N = pred.shape
    p_item = jnp.dtype(pred.dtype).itemsize
    t_item = jnp.dtype(targets.dtype).itemsize

    # --- row block (sublane dim): multiple of the widest sublane packing; ----
    # capped near ceil(B/2) for larger B so the row axis alone gives >= 2
    # "parallel" grid steps (both v7x TensorCores busy).        [perf item 2]
    sub = max(8, 32 // min(p_item, t_item))
    tb = min(_round_up(B, sub), 256)
    if B >= 2 * sub and _cdiv(B, tb) < 2:
        tb = min(tb, _round_up(_cdiv(B, 2), sub))
    n_row_blocks = _cdiv(B, tb)

    # --- N tile (lane dim): largest tile whose double-buffered input stream --
    # fits ~16 MiB (~2-4 MiB per input buffer is already at the HBM roofline
    # and leaves most of v7x's 64 MiB/TC VMEM free).          [perf items 3/7]
    tn_max = _INPUT_VMEM_BUDGET // (2 * tb * (p_item + t_item))
    tn_max = max(128, tn_max // 128 * 128)
    tn = min(_round_up(N, 128), tn_max)
    if block_cols is not None:
        tn = _round_up(block_cols, 128)
    n_tiles = _cdiv(N, tn)
    tail_cols = N % tn                      # columns in the ragged last tile

    # --- reduction shards: small-B problems get their 2nd parallel grid step -
    # by splitting the N reduction in two.                      [perf item 2]
    n_shards = 2 if (n_row_blocks == 1 and n_tiles >= 2) else 1
    tiles_per_shard = _cdiv(n_tiles, n_shards)

    kernel = _make_kernel(tb=tb, tn=tn, n_tiles=n_tiles, n_shards=n_shards,
                          tiles_per_shard=tiles_per_shard, tail_cols=tail_cols,
                          panel_lanes=_PANEL_LANES)

    # Column index map.  If the tile count does not split evenly across the
    # shards, the single padding step of the last shard is clamped back in
    # range (its accumulation is skipped in-kernel).
    if n_shards * tiles_per_shard == n_tiles:
        col_map = lambda s, i, j: (i, s * tiles_per_shard + j)
    else:
        col_map = lambda s, i, j: (i, jnp.minimum(s * tiles_per_shard + j,
                                                  n_tiles - 1))
    part_spec = pl.BlockSpec((None, tb, 1), lambda s, i, j: (s, i, 0))

    # ~1.25x the actual double-buffered footprint.              [perf item 3]
    vmem_need = (2 * tb * tn * (p_item + t_item)     # 2x-buffered input tiles
                 + 2 * 2 * 2 * tb * 4)               # 2x-buffered (tb,1) outputs
    vmem_limit = int(min(max(1.25 * vmem_need + (1 << 20), 8 << 20), 64 << 20))

    num_part, den_part = pl.pallas_call(
        kernel,
        out_shape=(jax.ShapeDtypeStruct((n_shards, B, 1), jnp.float32),
                   jax.ShapeDtypeStruct((n_shards, B, 1), jnp.float32)),
        grid_spec=pltpu.PrefetchScalarGridSpec(
            num_scalar_prefetch=0,
            grid=(n_shards, n_row_blocks, tiles_per_shard),
            in_specs=[pl.BlockSpec((tb, tn), col_map),
                      pl.BlockSpec((tb, tn), col_map)],
            out_specs=(part_spec, part_spec),
        ),
        compiler_params=pltpu.CompilerParams(
            dimension_semantics=("parallel", "parallel", "arbitrary"),
            vmem_limit_bytes=vmem_limit,
        ),
    )(pred, targets)

    # Tiny O(n_shards * B) combine + divide + mean stays in the wrapper.
    num = 2.0 * jnp.sum(num_part[..., 0], axis=0) + 1.0
    den = jnp.sum(den_part[..., 0], axis=0) + 1.0
    return jnp.mean(1.0 - num / den)


def dice_loss_ref(pred, targets):
    pred = pred.astype(jnp.float32)
    targets = targets.astype(jnp.float32)
    num = 2.0 * jnp.sum(pred * targets, axis=1) + 1.0
    den = jnp.sum(pred + targets, axis=1) + 1.0
    return jnp.mean(1.0 - num / den)


if __name__ == "__main__":
    key = jax.random.PRNGKey(0)
    k1, k2 = jax.random.split(key)

    def check(pred, targets, name, **kw):
        out = jax.block_until_ready(dice_loss(pred, targets, **kw))
        ref = dice_loss_ref(pred, targets)
        assert jnp.allclose(out, ref, rtol=1e-5, atol=1e-5), (name, out, ref)

    # 1) aligned shapes, f32 (single tile, single shard)
    p = jax.random.uniform(k1, (8, 256), dtype=jnp.float32)
    t = (jax.random.uniform(k2, (8, 256)) > 0.5).astype(jnp.float32)
    check(p, t, "aligned f32")

    # 2) ragged B and N: partial row block + masked tail lanes
    p = jax.random.uniform(k1, (5, 300), dtype=jnp.float32)
    t = (jax.random.uniform(k2, (5, 300)) > 0.5).astype(jnp.float32)
    check(p, t, "ragged f32")

    # 3) mixed low-precision inputs (bf16 pred) + masked tail panel
    p = jax.random.uniform(k1, (4, 1200), dtype=jnp.float32).astype(jnp.bfloat16)
    t = (jax.random.uniform(k2, (4, 1200)) > 0.5).astype(jnp.float32)
    check(p, t, "bf16 pred")

    # 4) small-B / multi-tile path: 2 reduction shards, odd tile count
    #    (clamped padding step) and a masked tail tile
    p = jax.random.uniform(k1, (2, 1200), dtype=jnp.float32)
    t = (jax.random.uniform(k2, (2, 1200)) > 0.5).astype(jnp.float32)
    check(p, t, "2-shard reduction", block_cols=256)

    # 5) larger B: row axis split into 2 parallel blocks (partial last block)
    p = jax.random.uniform(k1, (20, 512), dtype=jnp.float32)
    t = (jax.random.uniform(k2, (20, 512)) > 0.5).astype(jnp.float32)
    check(p, t, "2 row blocks")

    print("KERNEL_OK")
</pallas_src>

<mosaic_0001>
module attributes {stable_mosaic.version = 11 : i64} {
  func.func @kernel(%arg0: i32, %arg1: i32, %arg2: i32, %arg3: memref<8x256xf32, #tpu.memory_space<vmem>>, %arg4: memref<8x256xf32, #tpu.memory_space<vmem>>, %arg5: memref<1x8x1xf32, #tpu.memory_space<vmem>>, %arg6: memref<1x8x1xf32, #tpu.memory_space<vmem>>) attributes {dimension_semantics = [#tpu.dimension_semantics<parallel>, #tpu.dimension_semantics<parallel>, #tpu.dimension_semantics<arbitrary>], iteration_bounds = array<i64: 1, 1, 1>, scalar_prefetch = 0 : i64, scratch_operands = 0 : i64, tpu.core_type = #tpu.core_type<tc>, window_params = [{transform_indices = @transform_0, window_bounds = array<i64: 8, 256>}, {transform_indices = @transform_1, window_bounds = array<i64: 8, 256>}, {transform_indices = @transform_2, window_bounds = array<i64: 1, 8, 1>}, {transform_indices = @transform_3, window_bounds = array<i64: 1, 8, 1>}]} {
    %c0_i32 = arith.constant 0 : i32
    %0 = arith.cmpi eq, %arg2, %c0_i32 : i32
    %1 = arith.extui %0 : i1 to i32
    %c0_i32_0 = arith.constant 0 : i32
    %2 = arith.cmpi ne, %1, %c0_i32_0 : i32
    scf.if %2 {
      %cst_17 = arith.constant 0.000000e+00 : f32
      %23 = vector.broadcast %cst_17 : f32 to vector<8x1xf32>
      %c0_18 = arith.constant 0 : index
      %c0_19 = arith.constant 0 : index
      %c0_20 = arith.constant 0 : index
      %24 = vector.load %arg5[%c0_18, %c0_19, %c0_20] : memref<1x8x1xf32, #tpu.memory_space<vmem>>, vector<1x8x1xf32>
      %25 = vector.shape_cast %24 : vector<1x8x1xf32> to vector<8x1xf32>
      %26 = vector.shape_cast %23 : vector<8x1xf32> to vector<1x8x1xf32>
      tpu.vector_store %arg5[%c0_18, %c0_19, %c0_20], %26 {strides = array<i32>} : memref<1x8x1xf32, #tpu.memory_space<vmem>>, vector<1x8x1xf32>,
      %cst_21 = arith.constant 0.000000e+00 : f32
      %27 = vector.broadcast %cst_21 : f32 to vector<8x1xf32>
      %c0_22 = arith.constant 0 : index
      %c0_23 = arith.constant 0 : index
      %c0_24 = arith.constant 0 : index
      %28 = vector.load %arg6[%c0_22, %c0_23, %c0_24] : memref<1x8x1xf32, #tpu.memory_space<vmem>>, vector<1x8x1xf32>
      %29 = vector.shape_cast %28 : vector<1x8x1xf32> to vector<8x1xf32>
      %30 = vector.shape_cast %27 : vector<8x1xf32> to vector<1x8x1xf32>
      tpu.vector_store %arg6[%c0_22, %c0_23, %c0_24], %30 {strides = array<i32>} : memref<1x8x1xf32, #tpu.memory_space<vmem>>, vector<1x8x1xf32>,
    } else {
    }
    %c0 = arith.constant 0 : index
    %c0_1 = arith.constant 0 : index
    %3 = vector.load %arg3[%c0, %c0_1] : memref<8x256xf32, #tpu.memory_space<vmem>>, vector<8x256xf32>
    %c0_2 = arith.constant 0 : index
    %c0_3 = arith.constant 0 : index
    %4 = vector.load %arg4[%c0_2, %c0_3] : memref<8x256xf32, #tpu.memory_space<vmem>>, vector<8x256xf32>
    %5 = arith.mulf %3, %4 : vector<8x256xf32>
    %6 = arith.addf %3, %4 : vector<8x256xf32>
    %c0_4 = arith.constant 0 : index
    %c0_5 = arith.constant 0 : index
    %c0_6 = arith.constant 0 : index
    %7 = vector.load %arg5[%c0_4, %c0_5, %c0_6] : memref<1x8x1xf32, #tpu.memory_space<vmem>>, vector<1x8x1xf32>
    %8 = vector.shape_cast %7 : vector<1x8x1xf32> to vector<8x1xf32>
    %cst = arith.constant dense<0.000000e+00> : vector<8xf32>
    %9 = vector.multi_reduction <add>, %5, %cst [1] : vector<8x256xf32> to vector<8xf32>
    %10 = vector.shape_cast %9 : vector<8xf32> to vector<8x1xf32>
    %11 = arith.addf %8, %10 : vector<8x1xf32>
    %c0_7 = arith.constant 0 : index
    %c0_8 = arith.constant 0 : index
    %c0_9 = arith.constant 0 : index
    %12 = vector.load %arg5[%c0_7, %c0_8, %c0_9] : memref<1x8x1xf32, #tpu.memory_space<vmem>>, vector<1x8x1xf32>
    %13 = vector.shape_cast %12 : vector<1x8x1xf32> to vector<8x1xf32>
    %14 = vector.shape_cast %11 : vector<8x1xf32> to vector<1x8x1xf32>
    tpu.vector_store %arg5[%c0_7, %c0_8, %c0_9], %14 {strides = array<i32>} : memref<1x8x1xf32, #tpu.memory_space<vmem>>, vector<1x8x1xf32>,
    %c0_10 = arith.constant 0 : index
    %c0_11 = arith.constant 0 : index
    %c0_12 = arith.constant 0 : index
    %15 = vector.load %arg6[%c0_10, %c0_11, %c0_12] : memref<1x8x1xf32, #tpu.memory_space<vmem>>, vector<1x8x1xf32>
    %16 = vector.shape_cast %15 : vector<1x8x1xf32> to vector<8x1xf32>
    %cst_13 = arith.constant dense<0.000000e+00> : vector<8xf32>
    %17 = vector.multi_reduction <add>, %6, %cst_13 [1] : vector<8x256xf32> to vector<8xf32>
    %18 = vector.shape_cast %17 : vector<8xf32> to vector<8x1xf32>
    %19 = arith.addf %16, %18 : vector<8x1xf32>
    %c0_14 = arith.constant 0 : index
    %c0_15 = arith.constant 0 : index
    %c0_16 = arith.constant 0 : index
    %20 = vector.load %arg6[%c0_14, %c0_15, %c0_16] : memref<1x8x1xf32, #tpu.memory_space<vmem>>, vector<1x8x1xf32>
    %21 = vector.shape_cast %20 : vector<1x8x1xf32> to vector<8x1xf32>
    %22 = vector.shape_cast %19 : vector<8x1xf32> to vector<1x8x1xf32>
    tpu.vector_store %arg6[%c0_14, %c0_15, %c0_16], %22 {strides = array<i32>} : memref<1x8x1xf32, #tpu.memory_space<vmem>>, vector<1x8x1xf32>,
    return
  }
  func.func @transform_0(%arg0: i32, %arg1: i32, %arg2: i32) -> (i32, i32) {
    %c1_i32 = arith.constant 1 : i32
    %0 = arith.muli %arg0, %c1_i32 : i32
    %1 = arith.addi %0, %arg2 : i32
    %c0_i32 = arith.constant 0 : i32
    return %arg1, %1 : i32, i32
  }
  func.func @transform_1(%arg0: i32, %arg1: i32, %arg2: i32) -> (i32, i32) {
    %c1_i32 = arith.constant 1 : i32
    %0 = arith.muli %arg0, %c1_i32 : i32
    %1 = arith.addi %0, %arg2 : i32
    %c0_i32 = arith.constant 0 : i32
    return %arg1, %1 : i32, i32
  }
  func.func @transform_2(%arg0: i32, %arg1: i32, %arg2: i32) -> (i32, i32, i32) {
    %c0_i32 = arith.constant 0 : i32
    %c0_i32_0 = arith.constant 0 : i32
    return %arg0, %arg1, %c0_i32 : i32, i32, i32
  }
  func.func @transform_3(%arg0: i32, %arg1: i32, %arg2: i32) -> (i32, i32, i32) {
    %c0_i32 = arith.constant 0 : i32
    %c0_i32_0 = arith.constant 0 : i32
    return %arg0, %arg1, %c0_i32 : i32, i32, i32
  }
}

</mosaic_0001>

<bundles_post_ra>
// kernel: tpu_custom_call.1
= control target key start
LH: loop header
LB: loop body
LE: loop exit
PB: predicated region body
PF: predicated region fallthrough
CT: control target
= control target key end

     0   :  { %9 = vsyncpa [#allocation3], 0  ;;  %s207_s0 = inlined_call_operand.hbm [shape: f32[8,256], index: 0, kind: input, shape index: {}]   ;;  %s208_s1 = inlined_call_operand.hbm [shape: f32[8,256], index: 1, kind: input, shape index: {}]   ;;  %s209_s2 = inlined_call_operand.vmem [shape: f32[1,8,1], index: 2, kind: output, shape index: {0}]   ;;  %s210_s3 = inlined_call_operand.vmem [shape: f32[1,8,1], index: 3, kind: output, shape index: {1}]  }
   0x1   :  { %10 = vsyncpa [#allocation5], 0  ;;  %s138_s12 = smov [#allocation2]   ;;  %s139_s14 = smov [#allocation4]  }
   0x2   :  { %s21_s13 = sshll.u32 %s138_s12, 4  ;;  %s35_s15 = sshll.u32 %s139_s14, 4  ;;  %s22_s13 = int_to_ptr.vmem [resolvable:$true] %s21_s13  ;;  %s36_s15 = int_to_ptr.vmem [resolvable:$true] %s35_s15 }
   0x3   :  { %s90_s18 = scalar_lea.hbm %s207_s0, 256 }
   0x4   :  { %p91_p0 = scmp.ne.s32.totalorder %s207_s0, %s90_s18  ;;  %p94_p1 = scmp.lt.u32.totalorder %s90_s18, %s207_s0 }
   0x6   :  { %p96_p2 = pnand %p94_p1, %p91_p0 }
   0x8   :  { %99 = shalt.err (!%p96_p2)
}
   0x9   :  { %s100_s23 = scalar_lea.vmem %s22_s13, 256  ;;  %p105_p4 = scmp.lt.s32.totalorder %s22_s13, %s22_s13 }
   0xa   :  { %p101_p3 = scmp.ne.s32.totalorder %s22_s13, %s100_s23  ;;  %p106_p5 = scmp.lt.s32.totalorder %s100_s23, %s100_s23 }
   0xc   :  { %p107_p6 = por %p106_p5, %p105_p4 }
   0xe   :  { %p108_p7 = pnand %p107_p6, %p101_p3 }
  0x10   :  { %111 = shalt.err (!%p108_p7)
}
  0x11   :  { %24 = dma.hbm_to_vmem [thread:$0]  %s207_s0, 256, %s22_s13, [#allocation3]  }
  0x12   :  { %s112_s28 = scalar_lea.hbm %s208_s1, 256 }
  0x13   :  { %p113_p8 = scmp.ne.s32.totalorder %s208_s1, %s112_s28  ;;  %p116_p9 = scmp.lt.u32.totalorder %s112_s28, %s208_s1 }
  0x15   :  { %p118_p10 = pnand %p116_p9, %p113_p8 }
  0x17   :  { %121 = shalt.err (!%p118_p10)
}
  0x18   :  { %s122_s6 = scalar_lea.vmem %s36_s15, 256  ;;  %p127_p12 = scmp.lt.s32.totalorder %s36_s15, %s36_s15 }
  0x19   :  { %p123_p11 = scmp.ne.s32.totalorder %s36_s15, %s122_s6  ;;  %p128_p13 = scmp.lt.s32.totalorder %s122_s6, %s122_s6 }
  0x1b   :  { %p129_p0 = por %p128_p13, %p127_p12 }
  0x1d   :  { %p130_p1 = pnand %p129_p0, %p123_p11 }
  0x1f   :  { %133 = shalt.err (!%p130_p1)
}
  0x20   :  { %38 = dma.hbm_to_vmem [thread:$0]  %s208_s1, 256, %s36_s15, [#allocation5]  }
  0x21   :  { %134 = dma.done.wait [#allocation3], 256  }
  0x22   :  { %135 = vsyncadd [#allocation3], 4294967040 }
  0x23   :  { %136 = dma.done.wait [#allocation5], 256  }
  0x24   :  { %137 = vsyncadd [#allocation5], 4294967040  ;;  %vm53_vm0 = vcmask 7168   ;;  %v140_v0 = vmov 0.0   ;;  %v56_v1 = vld [vmem:[#allocation2] sm:$0xff]  ;;  %v57_v2 = vld [vmem:[#allocation2 + $0x8] sm:$0xff] }
  0x25   :  { %54 = vst.msk [vmem:[%s209_s2] sm:$0xff] %vm53_vm0, %v140_v0  ;;  %55 = vst.msk [vmem:[%s210_s3] sm:$0xff] %vm53_vm0, %v140_v0  ;;  %v58_v3 = vld [vmem:[#allocation4] sm:$0xff]  ;;  %v59_v4 = vld [vmem:[#allocation4 + $0x8] sm:$0xff] }
  0x26   :  { %v60_v5 = vmul.f32 %v58_v3, %v56_v1  ;;  %v61_v6 = vmul.f32 %v59_v4, %v57_v2  ;;  %v62_v7 = vadd.f32 %v58_v3, %v56_v1  ;;  %v63_v8 = vadd.f32 %v59_v4, %v57_v2 }
  0x28   :  { %v65_v9 = vadd.f32 %v61_v6, %v60_v5  ;;  %v72_v10 = vadd.f32 %v63_v8, %v62_v7 }
  0x2a   :  { %66 = vadd.xlane.f32.xlu0 %v65_v9 }
  0x2c   :  { %v64_v11 = vld [vmem:[%s209_s2] sm:$0xff] }
  0x2d   :  { %v71_v14 = vld [vmem:[%s210_s3] sm:$0xff] }
  0x2e   :  { %73 = vadd.xlane.f32.xlu0 %v72_v10 }
  0xb7   :  { %v67_v12 = vpop.xlane.xlu0 %66 }
  0xb8   :  { %v68_v13 = vadd.f32 %v67_v12, %v64_v11 }
  0xba   :  { %70 = vst.msk [vmem:[%s209_s2] sm:$0xff] %vm53_vm0, %v68_v13 }
  0xbb   :  { %v74_v15 = vpop.xlane.xlu0 %73 }
  0xbc   :  { %v75_v16 = vadd.f32 %v74_v15, %v71_v14 }
  0xbe   :  { %76 = vst.msk [vmem:[%s210_s3] sm:$0xff] %vm53_vm0, %v75_v16 }
  0xbf   :  { %85 = vsyncpa [#allocation3], 1 }
  0xc0   :  { %86 = vsyncpa [#allocation5], 1 }

</bundles_post_ra>
